<compile_context>
chip_gen: v7x
topology: tpu7x:2x2x1
jax: 0.10.0
libtpu: 0.0.40
codegen_flags: <defaults>
</compile_context>

<pallas_src>
import jax
import jax.numpy as jnp
from jax.experimental import pallas as pl
from jax.experimental.pallas import tpu as pltpu


def _round_up(x, m):
    return ((x + m - 1) // m) * m


def _choose_tile(batch, tb_max=8192):
    """Pick a lane-dense batch tile (multiple of 128) and padded batch size.

    tb_max=8192: per-step DMA (3 x 32 x 8192 x 2 B = 1.5 MiB) is well above
    the ~0.35 us/step pipeline overhead, while double-buffered VMEM is only
    ~3 MiB (fine everywhere, incl. v5e's 16 MiB scoped default).  When the
    batch allows it we force >= 2 grid steps so dimension_semantics
    ("parallel",) can actually shard across both v7x TensorCores (harmless on
    single-TC v5e/v6e).
    """
    b128 = _round_up(max(batch, 1), 128)
    nt = pl.cdiv(b128, tb_max)
    if b128 >= 2 * 128:
        nt = max(nt, 2)
    tb = _round_up(pl.cdiv(b128, nt), 128)
    return tb, nt * tb


def _bpr_score_kernel(u_ref, p_ref, n_ref, out_ref):
    # u/p/n: (R, TB) bf16 tiles — batch rides the 128-lane axis, rank on
    #        sublanes, so vregs are dense even for small rank.
    # out:   (2, TB) f32 tile — row 0 = pos scores, row 1 = neg scores
    #        (single lane-dense packed output, no 1-wide masked stores).
    u = u_ref[...].astype(jnp.float32)      # cast on load; accumulate in f32
    p = p_ref[...].astype(jnp.float32)
    n = n_ref[...].astype(jnp.float32)
    out_ref[0:1, :] = jnp.sum(u * p, axis=0, keepdims=True)
    out_ref[1:2, :] = jnp.sum(u * n, axis=0, keepdims=True)


def bpr_scores_pallas(u_t, p_t, n_t, *, tb=None):
    """u_t/p_t/n_t: (R, B) arrays with batch on the minor/lane axis.

    Returns (pos_scores, neg_scores), each (B,) float32.
    """
    R, B = u_t.shape
    if tb is None:
        tb, _ = _choose_tile(B)
    assert tb % 128 == 0, "batch tile must be a multiple of 128 lanes"
    b_pad = _round_up(B, tb)
    if b_pad != B:
        # Fallback only — forward() pre-pads the id vectors so this is skipped.
        pad = ((0, 0), (0, b_pad - B))
        u_t, p_t, n_t = (jnp.pad(a, pad) for a in (u_t, p_t, n_t))

    grid = (b_pad // tb,)
    in_spec = pl.BlockSpec((R, tb), lambda i: (0, i))
    out_spec = pl.BlockSpec((2, tb), lambda i: (0, i))

    out = pl.pallas_call(
        _bpr_score_kernel,
        out_shape=jax.ShapeDtypeStruct((2, b_pad), jnp.float32),
        grid=grid,
        in_specs=[in_spec, in_spec, in_spec],
        out_specs=out_spec,
        compiler_params=pltpu.CompilerParams(
            dimension_semantics=("parallel",),
        ),
    )(u_t, p_t, n_t)
    return out[0, :B], out[1, :B]


class BPRPallas:
    """JAX/Pallas port of the PyTorch BPR module (forward pass only)."""

    def __init__(self, num_users, num_items, rank, key):
        ku, ki = jax.random.split(key)
        # bf16 storage halves HBM bytes on this bandwidth-bound op; the kernel
        # accumulates the rank-reduction in f32.
        self.user_emb = (
            jax.random.normal(ku, (num_users, rank), jnp.float32) * 0.1
        ).astype(jnp.bfloat16)
        self.item_emb = (
            jax.random.normal(ki, (num_items, rank), jnp.float32) * 0.1
        ).astype(jnp.bfloat16)

    def forward(self, user_ids, pos_items, neg_items):
        b = user_ids.shape[0]
        tb, b_pad = _choose_tile(b)
        if b_pad != b:
            # Pad the cheap int32 id vectors (NOT the gathered float tensors):
            # padded slots gather row 0 and are sliced off below.
            pad = (0, b_pad - b)
            user_ids = jnp.pad(user_ids, pad)
            pos_items = jnp.pad(pos_items, pad)
            neg_items = jnp.pad(neg_items, pad)
        # Row gather on the natural (num, R) tables (fast TPU gather path),
        # then ONE explicit transpose to the (R, B) lane-dense kernel layout.
        u = jnp.take(self.user_emb, user_ids, axis=0).T   # (R, b_pad) bf16
        p = jnp.take(self.item_emb, pos_items, axis=0).T  # (R, b_pad) bf16
        n = jnp.take(self.item_emb, neg_items, axis=0).T  # (R, b_pad) bf16
        # TODO(synk): fuse the row gather into the kernel (VMEM-resident table
        #             + scalar-prefetched ids / manual DMA gather) to remove
        #             this remaining HBM round-trip.
        pos, neg = bpr_scores_pallas(u, p, n, tb=tb)
        return pos[:b], neg[:b]

    def bpr_loss(self, pos_scores, neg_scores):
        # -log(sigmoid(pos - neg)).mean()  ==  softplus(neg - pos).mean()
        # TODO(synk): optionally emit per-tile softplus partial sums from the
        #             kernel (masking padded lanes) to skip re-reading scores.
        return jnp.mean(jax.nn.softplus(neg_scores - pos_scores))


if __name__ == "__main__":
    num_users, num_items, rank, batch = 64, 128, 32, 8
    key = jax.random.PRNGKey(0)
    k_model, k_u, k_p, k_n = jax.random.split(key, 4)

    model = BPRPallas(num_users, num_items, rank, k_model)

    user_ids = jax.random.randint(k_u, (batch,), 0, num_users, dtype=jnp.int32)
    pos_items = jax.random.randint(k_p, (batch,), 0, num_items, dtype=jnp.int32)
    neg_items = jax.random.randint(k_n, (batch,), 0, num_items, dtype=jnp.int32)

    pos_scores, neg_scores = model.forward(user_ids, pos_items, neg_items)
    jax.block_until_ready((pos_scores, neg_scores))

    # correctness check against plain-JAX reference (same bf16 params, f32 acc)
    u = jnp.take(model.user_emb, user_ids, axis=0).astype(jnp.float32)
    p = jnp.take(model.item_emb, pos_items, axis=0).astype(jnp.float32)
    n = jnp.take(model.item_emb, neg_items, axis=0).astype(jnp.float32)
    ref_pos = jnp.sum(u * p, axis=-1)
    ref_neg = jnp.sum(u * n, axis=-1)
    assert pos_scores.shape == (batch,) and neg_scores.shape == (batch,)
    assert pos_scores.dtype == jnp.float32
    assert jnp.allclose(pos_scores, ref_pos, atol=1e-4, rtol=1e-4)
    assert jnp.allclose(neg_scores, ref_neg, atol=1e-4, rtol=1e-4)

    # exercise the loss helper too (pure JAX, not part of forward)
    loss = model.bpr_loss(pos_scores, neg_scores)
    jax.block_until_ready(loss)

    print("KERNEL_OK")
</pallas_src>

<mosaic_0001>
module attributes {stable_mosaic.version = 11 : i64} {
  func.func @_bpr_score_kernel(%arg0: i32, %arg1: memref<32x128xbf16, #tpu.memory_space<vmem>>, %arg2: memref<32x128xbf16, #tpu.memory_space<vmem>>, %arg3: memref<32x128xbf16, #tpu.memory_space<vmem>>, %arg4: memref<2x128xf32, #tpu.memory_space<vmem>>) attributes {dimension_semantics = [#tpu.dimension_semantics<parallel>], iteration_bounds = array<i64: 1>, scalar_prefetch = 0 : i64, scratch_operands = 0 : i64, tpu.core_type = #tpu.core_type<tc>, window_params = [{transform_indices = @transform_0, window_bounds = array<i64: 32, 128>}, {transform_indices = @transform_1, window_bounds = array<i64: 32, 128>}, {transform_indices = @transform_2, window_bounds = array<i64: 32, 128>}, {transform_indices = @transform_3, window_bounds = array<i64: 2, 128>}]} {
    %c0 = arith.constant 0 : index
    %c0_0 = arith.constant 0 : index
    %0 = vector.load %arg1[%c0, %c0_0] : memref<32x128xbf16, #tpu.memory_space<vmem>>, vector<32x128xbf16>
    %1 = arith.extf %0 : vector<32x128xbf16> to vector<32x128xf32>
    %c0_1 = arith.constant 0 : index
    %c0_2 = arith.constant 0 : index
    %2 = vector.load %arg2[%c0_1, %c0_2] : memref<32x128xbf16, #tpu.memory_space<vmem>>, vector<32x128xbf16>
    %3 = arith.extf %2 : vector<32x128xbf16> to vector<32x128xf32>
    %c0_3 = arith.constant 0 : index
    %c0_4 = arith.constant 0 : index
    %4 = vector.load %arg3[%c0_3, %c0_4] : memref<32x128xbf16, #tpu.memory_space<vmem>>, vector<32x128xbf16>
    %5 = arith.extf %4 : vector<32x128xbf16> to vector<32x128xf32>
    %6 = arith.mulf %1, %3 : vector<32x128xf32>
    %cst = arith.constant dense<0.000000e+00> : vector<128xf32>
    %7 = vector.multi_reduction <add>, %6, %cst [0] : vector<32x128xf32> to vector<128xf32>
    %8 = vector.shape_cast %7 : vector<128xf32> to vector<1x128xf32>
    %c0_5 = arith.constant 0 : index
    %c0_6 = arith.constant 0 : index
    %9 = vector.load %arg4[%c0_5, %c0_6] : memref<2x128xf32, #tpu.memory_space<vmem>>, vector<1x128xf32>
    tpu.vector_store %arg4[%c0_5, %c0_6], %8 {strides = array<i32>} : memref<2x128xf32, #tpu.memory_space<vmem>>, vector<1x128xf32>,
    %10 = arith.mulf %1, %5 : vector<32x128xf32>
    %cst_7 = arith.constant dense<0.000000e+00> : vector<128xf32>
    %11 = vector.multi_reduction <add>, %10, %cst_7 [0] : vector<32x128xf32> to vector<128xf32>
    %12 = vector.shape_cast %11 : vector<128xf32> to vector<1x128xf32>
    %c1 = arith.constant 1 : index
    %c0_8 = arith.constant 0 : index
    %13 = vector.load %arg4[%c1, %c0_8] : memref<2x128xf32, #tpu.memory_space<vmem>>, vector<1x128xf32>
    tpu.vector_store %arg4[%c1, %c0_8], %12 {strides = array<i32>} : memref<2x128xf32, #tpu.memory_space<vmem>>, vector<1x128xf32>,
    return
  }
  func.func @transform_0(%arg0: i32) -> (i32, i32) {
    %c0_i32 = arith.constant 0 : i32
    %c0_i32_0 = arith.constant 0 : i32
    return %c0_i32, %arg0 : i32, i32
  }
  func.func @transform_1(%arg0: i32) -> (i32, i32) {
    %c0_i32 = arith.constant 0 : i32
    %c0_i32_0 = arith.constant 0 : i32
    return %c0_i32, %arg0 : i32, i32
  }
  func.func @transform_2(%arg0: i32) -> (i32, i32) {
    %c0_i32 = arith.constant 0 : i32
    %c0_i32_0 = arith.constant 0 : i32
    return %c0_i32, %arg0 : i32, i32
  }
  func.func @transform_3(%arg0: i32) -> (i32, i32) {
    %c0_i32 = arith.constant 0 : i32
    %c0_i32_0 = arith.constant 0 : i32
    return %c0_i32, %arg0 : i32, i32
  }
}

</mosaic_0001>

<bundles_post_ra>
// kernel: tpu_custom_call.1
= control target key start
LH: loop header
LB: loop body
LE: loop exit
PB: predicated region body
PF: predicated region fallthrough
CT: control target
= control target key end

     0   :  { %8 = vsyncpa [#allocation3], 0  ;;  %s341_s0 = inlined_call_operand.hbm [shape: bf16[32,128], index: 0, kind: input, shape index: {}]   ;;  %s342_s1 = inlined_call_operand.hbm [shape: bf16[32,128], index: 1, kind: input, shape index: {}]   ;;  %s343_s2 = inlined_call_operand.hbm [shape: bf16[32,128], index: 2, kind: input, shape index: {}]   ;;  %s344_s3 = inlined_call_operand.hbm [shape: f32[2,128], index: 3, kind: output, shape index: {}]  }
   0x1   :  { %9 = vsyncpa [#allocation6], 0 }
   0x2   :  { %10 = vsyncpa [#allocation4], 0  ;;  %s251_s12 = smov [#allocation5]   ;;  %s252_s14 = smov [#allocation2]  }
   0x3   :  { %s28_s13 = sshll.u32 %s251_s12, 4  ;;  %s16_s15 = sshll.u32 %s252_s14, 4  ;;  %s29_s13 = int_to_ptr.vmem [resolvable:$true] %s28_s13  ;;  %s277_s15 = int_to_ptr.vmem [resolvable:$true] %s16_s15 }
   0x4   :  { %s157_s18 = scalar_lea.hbm %s342_s1, 256 }
   0x5   :  { %p158_p0 = scmp.ne.s32.totalorder %s342_s1, %s157_s18  ;;  %p161_p1 = scmp.lt.u32.totalorder %s157_s18, %s342_s1 }
   0x7   :  { %p163_p2 = pnand %p161_p1, %p158_p0 }
   0x9   :  { %166 = shalt.err (!%p163_p2)
}
   0xa   :  { %s167_s23 = scalar_lea.vmem %s29_s13, 256  ;;  %p172_p4 = scmp.lt.s32.totalorder %s29_s13, %s29_s13 }
   0xb   :  { %p168_p3 = scmp.ne.s32.totalorder %s29_s13, %s167_s23  ;;  %p173_p5 = scmp.lt.s32.totalorder %s167_s23, %s167_s23 }
   0xd   :  { %p174_p6 = por %p173_p5, %p172_p4 }
   0xf   :  { %p175_p7 = pnand %p174_p6, %p168_p3 }
  0x11   :  { %178 = shalt.err (!%p175_p7)
}
  0x12   :  { %s253_s24 = smov 64   ;;  %s254_s25 = smov 4  }
  0x13   :  { %34 = dma.hbm_to_vmem [thread:$0]  %s342_s1, 256, %s29_s13, [#allocation6], %s253_s24, %s253_s24, %s254_s25  }
  0x14   :  { %s179_s30 = scalar_lea.hbm %s341_s0, 256 }
  0x15   :  { %p180_p8 = scmp.ne.s32.totalorder %s341_s0, %s179_s30  ;;  %p183_p9 = scmp.lt.u32.totalorder %s179_s30, %s341_s0 }
  0x17   :  { %p185_p10 = pnand %p183_p9, %p180_p8 }
  0x19   :  { %188 = shalt.err (!%p185_p10)
}
  0x1a   :  { %s189_s8 = scalar_lea.vmem %s277_s15, 256  ;;  %p194_p12 = scmp.lt.s32.totalorder %s277_s15, %s277_s15 }
  0x1b   :  { %p190_p11 = scmp.ne.s32.totalorder %s277_s15, %s189_s8  ;;  %p195_p13 = scmp.lt.s32.totalorder %s189_s8, %s189_s8 }
  0x1d   :  { %p196_p0 = por %p195_p13, %p194_p12 }
  0x1f   :  { %p197_p1 = pnand %p196_p0, %p190_p11 }
  0x21   :  { %200 = shalt.err (!%p197_p1)
}
  0x22   :  { %22 = dma.hbm_to_vmem [thread:$0]  %s341_s0, 256, %s277_s15, [#allocation3], %s253_s24, %s253_s24, %s254_s25  }
  0x23   :  { %s255_s10 = smov [#allocation7]   ;;  %s201_s14 = scalar_lea.hbm %s343_s2, 256 }
  0x24   :  { %s40_s11 = sshll.u32 %s255_s10, 4  ;;  %p202_p2 = scmp.ne.s32.totalorder %s343_s2, %s201_s14  ;;  %s41_s11 = int_to_ptr.vmem [resolvable:$true] %s40_s11 }
  0x25   :  { %p205_p3 = scmp.lt.u32.totalorder %s201_s14, %s343_s2 }
  0x27   :  { %p207_p4 = pnand %p205_p3, %p202_p2 }
  0x29   :  { %210 = shalt.err (!%p207_p4)
}
  0x2a   :  { %s211_s20 = scalar_lea.vmem %s41_s11, 256  ;;  %p216_p6 = scmp.lt.s32.totalorder %s41_s11, %s41_s11 }
  0x2b   :  { %p212_p5 = scmp.ne.s32.totalorder %s41_s11, %s211_s20  ;;  %p217_p7 = scmp.lt.s32.totalorder %s211_s20, %s211_s20 }
  0x2d   :  { %p218_p8 = por %p217_p7, %p216_p6 }
  0x2f   :  { %p219_p9 = pnand %p218_p8, %p212_p5 }
  0x31   :  { %222 = shalt.err (!%p219_p9)
}
  0x32   :  { %46 = dma.hbm_to_vmem [thread:$0]  %s343_s2, 256, %s41_s11, [#allocation6], %s253_s24, %s253_s24, %s254_s25  }
  0x33   :  { %245 = dma.done.wait [#allocation3], 256  }
  0x34   :  { %246 = vsyncadd [#allocation3], 4294967040 }
  0x35   :  { %247 = dma.done.wait [#allocation6], 512  }
  0x36   :  { %248 = vsyncadd [#allocation6], 4294966784  ;;  %v125_v0 = vld [vmem:[#allocation2] sm:$0xff]   ;;  %v148_v1 = vld [vmem:[#allocation2 + $0x8] sm:$0xff]   ;;  %s256_s2 = smov [#allocation8]  }
  0x37   :  { %v133_v2 = vld [vmem:[#allocation5] sm:$0xff]   ;;  %v126_v3 = vunpack.c.l.bf16 %v125_v0  ;;  %v127_v4 = vunpack.c.h.bf16 %v125_v0  ;;  %v130_v5 = vunpack.c.l.bf16 %v148_v1  ;;  %v131_v6 = vunpack.c.h.bf16 %v148_v1  ;;  %v149_v7 = vld [vmem:[#allocation5 + $0x8] sm:$0xff]   ;;  %v141_v8 = vld [vmem:[#allocation7] sm:$0xff]   ;;  %s114_s21 = sshll.u32 %s256_s2, 4  ;;  %s115_s21 = int_to_ptr.vmem [resolvable:$true] %s114_s21 }
  0x38   :  { %v150_v9 = vld [vmem:[#allocation7 + $0x8] sm:$0xff]   ;;  %v134_v10 = vunpack.c.l.bf16 %v133_v2  ;;  %v135_v11 = vunpack.c.h.bf16 %v133_v2  ;;  %v138_v12 = vunpack.c.l.bf16 %v149_v7  ;;  %v139_v13 = vunpack.c.h.bf16 %v149_v7  ;;  %s223_s22 = scalar_lea.vmem %s115_s21, 32  ;;  %p228_p11 = scmp.lt.s32.totalorder %s115_s21, %s115_s21 }
  0x39   :  { %v142_v14 = vunpack.c.l.bf16 %v141_v8  ;;  %v143_v15 = vunpack.c.h.bf16 %v141_v8  ;;  %v146_v16 = vunpack.c.l.bf16 %v150_v9  ;;  %v147_v17 = vunpack.c.h.bf16 %v150_v9  ;;  %p224_p10 = scmp.ne.s32.totalorder %s115_s21, %s223_s22  ;;  %p229_p12 = scmp.lt.s32.totalorder %s223_s22, %s223_s22 }
  0x3a   :  { %v80_v18 = vmul.f32 %v134_v10, %v126_v3  ;;  %v81_v19 = vmul.f32 %v135_v11, %v127_v4  ;;  %v82_v20 = vmul.f32 %v138_v12, %v130_v5  ;;  %v83_v24 = vmul.f32 %v139_v13, %v131_v6 }
  0x3b   :  { %v94_v21 = vmul.f32 %v142_v14, %v126_v3  ;;  %v95_v22 = vmul.f32 %v143_v15, %v127_v4  ;;  %v96_v23 = vmul.f32 %v146_v16, %v130_v5  ;;  %v97_v26 = vmul.f32 %v147_v17, %v131_v6  ;;  %p230_p13 = por %p229_p12, %p228_p11 }
  0x3c   :  { %v84_v25 = vadd.f32 %v81_v19, %v80_v18 }
  0x3d   :  { %v98_v27 = vadd.f32 %v95_v22, %v94_v21  ;;  %p231_p0 = pnand %p230_p13, %p224_p10 }
  0x3e   :  { %v85_v28 = vadd.f32 %v84_v25, %v82_v20 }
  0x3f   :  { %v99_v29 = vadd.f32 %v98_v27, %v96_v23 }
  0x40   :  { %v86_v30 = vadd.f32 %v85_v28, %v83_v24 }
  0x41   :  { %v100_v31 = vadd.f32 %v99_v29, %v97_v26 }
  0x42   :  { %v87_v32 = vrot.slane %v86_v30, 4 }
  0x43   :  { %v101_v33 = vrot.slane %v100_v31, 4 }
  0x44   :  { %v88_v34 = vadd.f32 %v87_v32, %v86_v30 }
  0x45   :  { %v102_v35 = vadd.f32 %v101_v33, %v100_v31 }
  0x46   :  { %v89_v36 = vrot.slane %v88_v34, 2 }
  0x47   :  { %v103_v37 = vrot.slane %v102_v35, 2 }
  0x48   :  { %v90_v38 = vadd.f32 %v89_v36, %v88_v34 }
  0x49   :  { %v104_v39 = vadd.f32 %v103_v37, %v102_v35 }
  0x4a   :  { %v91_v40 = vrot.slane %v90_v38, 1 }
  0x4b   :  { %v105_v41 = vrot.slane %v104_v39, 1 }
  0x4c   :  { %v92_v42 = vadd.f32 %v91_v40, %v90_v38 }
  0x4d   :  { %v106_v43 = vadd.f32 %v105_v41, %v104_v39 }
  0x4e   :  { %93 = vst [vmem:[#allocation8] sm:$0x1] %v92_v42 }
  0x4f   :  { %107 = vst [vmem:[#allocation8 + $0x1] sm:$0x1] %v106_v43 }
  0x50   :  { %234 = shalt.err (!%p231_p0)
}
  0x51   :  { %s235_s25 = scalar_lea.hbm %s344_s3, 32 }
  0x52   :  { %p236_p1 = scmp.ne.s32.totalorder %s344_s3, %s235_s25  ;;  %p239_p2 = scmp.lt.u32.totalorder %s235_s25, %s344_s3 }
  0x54   :  { %p241_p3 = pnand %p239_p2, %p236_p1 }
  0x56   :  { %244 = shalt.err (!%p241_p3)
}
  0x57   :  { %117 = dma.vmem_to_hbm [thread:$0]  %s115_s21, 32, %s344_s3, [#allocation4]  }
  0x58   :  { %249 = dma.done.wait [#allocation4], 32  }
  0x59   :  { %250 = vsyncadd [#allocation4], 4294967264 }
  0x5a   :  { %121 = vsyncpa [#allocation3], 1 }
  0x5b   :  { %122 = vsyncpa [#allocation6], 1 }
  0x5c   :  { %123 = vsyncpa [#allocation4], 1 }

</bundles_post_ra>
